<compile_context>
chip_gen: v7x
topology: tpu7x:2x2x1
jax: 0.10.0
libtpu: 0.0.40
codegen_flags: <defaults>
</compile_context>

<pallas_src>
import functools

import jax
import jax.numpy as jnp
from jax.experimental import pallas as pl
from jax.experimental.pallas import tpu as pltpu

N = 100          # number of samples (module default n=100)
D = 2            # feature dim (module default d=2)
N_INNER_OPT = 3  # inner SGD steps
INNER_LR = 0.01

_LANE = 128
_SUBLANE = 8
# Tasks per grid step.  Per task ~4.6 KiB (xt 4 KiB + wb 32 B + out 512 B);
# TB=512 double-buffered ~ 4.5 MiB, well under the 32 MiB scoped VMEM default
# on every generation (incl. v7x's 64 MiB physical).
_TB_TARGET = 512


def _round_up(x, m):
    return (x + m - 1) // m * m


def _meta_kernel(xt_ref, wb_ref, out_ref, *, d, n_inner, lr_over_n):
    """A block of independent meta-tasks.

    xt_ref : (TB, DP, NP) f32.  Per task: rows 0..d-1 = X^T, row d = ones
             (bias column), row d+1 = Y, remaining rows and padded lanes = 0.
    wb_ref : (TB, DP, 1)  f32.  Rows 0..d-1 = w, row d = b, rest = 0.
    out_ref: (TB, 1, NP)  f32 final logits (lane-dense).
    """
    xt = xt_ref[...]                                            # (TB, DP, NP)
    wb = wb_ref[...]                                            # (TB, DP, 1)
    dp = xt.shape[1]
    y = xt[:, d + 1:d + 2, :]                                   # (TB, 1, NP)

    # Only rows 0..d (w and b) receive updates; the Y row folded into xt and
    # the zero padding rows stay at zero weight, so logits = sum(wb*xt) is
    # exactly X@w + b.  lr/n is fused into the same constant (one multiply).
    row = jax.lax.broadcasted_iota(jnp.int32, (1, dp, 1), 1)
    upd_scale = jnp.where(row <= d, lr_over_n, 0.0).astype(jnp.float32)

    # Unrolled differentiable inner SGD (higher's diffopt.step with plain SGD).
    for _ in range(n_inner):
        logits = jnp.sum(wb * xt, axis=1, keepdims=True)        # (TB, 1, NP)
        s = jax.nn.sigmoid(logits) - y                          # n * dL/dlogits
        grad = jnp.sum(xt * s, axis=2, keepdims=True)           # (TB, DP, 1)
        wb = wb - upd_scale * grad

    out_ref[...] = jnp.sum(wb * xt, axis=1, keepdims=True)      # (TB, 1, NP)


def _run_kernel(xt, wb, *, d, n_true, n_inner, lr, tb):
    """xt:(Bp,DP,NP), wb:(Bp,DP,1) -> logits:(Bp,1,NP);  Bp % tb == 0."""
    b_pad, dp, np_ = xt.shape
    kernel = functools.partial(_meta_kernel, d=d, n_inner=n_inner,
                               lr_over_n=lr / float(n_true))
    out_shape = jax.ShapeDtypeStruct((b_pad, 1, np_), jnp.float32)

    if b_pad == tb:
        # Single block: skip the grid / pipeline entirely; whole arrays
        # resident in VMEM (no prologue / double-buffer cost).
        return pl.pallas_call(kernel, out_shape=out_shape)(xt, wb)

    return pl.pallas_call(
        kernel,
        out_shape=out_shape,
        grid=(b_pad // tb,),
        in_specs=[
            pl.BlockSpec((tb, dp, np_), lambda i: (i, 0, 0)),
            pl.BlockSpec((tb, dp, 1), lambda i: (i, 0, 0)),
        ],
        out_specs=pl.BlockSpec((tb, 1, np_), lambda i: (i, 0, 0)),
        compiler_params=pltpu.CompilerParams(
            dimension_semantics=("parallel",)),   # lets v7x split task-chunks
    )(xt, wb)


def _pack_batch(xs, ys, ws, bs, dp, n_pad):
    """Vectorized packing of a whole batch into the kernel layout.

    xs:(B,n,d), ys:(B,n), ws:(B,d), bs:(B,)
      -> xt:(B,dp,n_pad)  rows: X^T | ones | Y | zeros ; lanes padded to n_pad
         wb:(B,dp,1)      rows: w | b | zeros
    """
    B, n, d = xs.shape
    xs_t = jnp.transpose(jnp.asarray(xs, jnp.float32), (0, 2, 1))   # (B,d,n)
    ones = jnp.ones((B, 1, n), jnp.float32)                          # bias row
    y_row = jnp.asarray(ys, jnp.float32).reshape(B, 1, n)            # Y row
    zrows = jnp.zeros((B, dp - d - 2, n), jnp.float32)
    xt = jnp.concatenate([xs_t, ones, y_row, zrows], axis=1)         # (B,dp,n)
    xt = jnp.pad(xt, ((0, 0), (0, 0), (0, n_pad - n)))               # zero lanes

    wb = jnp.concatenate(
        [jnp.asarray(ws, jnp.float32).reshape(B, d),
         jnp.asarray(bs, jnp.float32).reshape(B, 1),
         jnp.zeros((B, dp - d - 1), jnp.float32)], axis=1)           # (B,dp)
    return xt, wb[..., None]


@functools.partial(jax.jit, static_argnames=("n_inner", "lr", "tb_target"))
def meta_dataset_forward_batch(xs, ys, ws, bs, *, n_inner=N_INNER_OPT,
                               lr=INNER_LR, tb_target=_TB_TARGET):
    """Batched tasks: xs:(B,n,d), ys:(B,n), ws:(B,d), bs:(B,) -> (B,n)."""
    B, n, d = xs.shape
    n_pad = _round_up(n, _LANE)
    dp = _round_up(d + 2, _SUBLANE)     # features + bias row + Y row

    if B == 1:
        tb = 1                           # no-grid fast path
    else:
        # >= 2 grid steps so both v7x TensorCores get work; cap by TB target.
        tb = min(tb_target, (B + 1) // 2)
    b_pad = _round_up(B, tb)

    xt, wb = _pack_batch(xs, ys, ws, bs, dp, n_pad)
    if b_pad != B:
        # Zero-padded tasks are harmless (grad is exactly zero) and dropped.
        xt = jnp.pad(xt, ((0, b_pad - B), (0, 0), (0, 0)))
        wb = jnp.pad(wb, ((0, b_pad - B), (0, 0), (0, 0)))

    out = _run_kernel(xt, wb, d=d, n_true=n, n_inner=n_inner, lr=lr, tb=tb)
    return out[:B, 0, :n]


def meta_dataset_forward(x, y, w, b, *, n_inner=N_INNER_OPT, lr=INNER_LR):
    """x:(n,d), y:(n,), w:(d,), b:(1,) -> logits:(n,)  (single task)."""
    out = meta_dataset_forward_batch(
        jnp.asarray(x)[None], jnp.asarray(y)[None], jnp.asarray(w)[None],
        jnp.reshape(jnp.asarray(b), (1,)), n_inner=n_inner, lr=lr)
    return out[0]


def _reference(x, y, w, b, *, n_inner=N_INNER_OPT, lr=INNER_LR):
    """Pure-JAX reference (elementwise only, no matmul precision surprises)."""
    n = x.shape[0]
    wv = jnp.asarray(w, jnp.float32).reshape(-1)
    bv = jnp.asarray(b, jnp.float32).reshape(())
    yv = jnp.asarray(y, jnp.float32).reshape(n)
    xf = jnp.asarray(x, jnp.float32)
    for _ in range(n_inner):
        logits = jnp.sum(xf * wv[None, :], axis=1) + bv
        g = (jax.nn.sigmoid(logits) - yv) / n
        wv = wv - lr * jnp.sum(xf * g[:, None], axis=0)
        bv = bv - lr * jnp.sum(g)
    return jnp.sum(xf * wv[None, :], axis=1) + bv


if __name__ == "__main__":
    # TODO(synk): torch draws fresh w/b inside forward() and `higher` builds
    # the differentiable inner loop; here w/b are explicit inputs and the
    # unrolled SGD reproduces the same forward math.
    key = jax.random.PRNGKey(0)
    kx, kw, kb, kbx, kbw, kbb = jax.random.split(key, 6)

    # --- single task, matching the module's defaults (n=100, d=2) ----------
    x = jax.random.normal(kx, (N, D), dtype=jnp.float32)                 # self.X
    y = jnp.concatenate([jnp.zeros(N // 2), jnp.ones(N // 2)])           # self.Y
    y = y.astype(jnp.float32)
    w = jax.random.normal(kw, (D,), dtype=jnp.float32)                   # self.w
    b = jax.random.normal(kb, (1,), dtype=jnp.float32)                   # self.b

    out = meta_dataset_forward(x, y, w, b)
    out = jax.block_until_ready(out)
    ref = _reference(x, y, w, b)
    assert out.shape == (N,)
    assert jnp.allclose(out, ref, atol=1e-5, rtol=1e-5), "single-task mismatch"

    # --- batched tasks: one pallas_call, grid over task-blocks -------------
    B = 5                    # odd on purpose: exercises task padding + grid=2
    xs = jax.random.normal(kbx, (B, N, D), dtype=jnp.float32)
    ys = jnp.broadcast_to(y, (B, N))
    ws = jax.random.normal(kbw, (B, D), dtype=jnp.float32)
    bs = jax.random.normal(kbb, (B,), dtype=jnp.float32)

    out_b = meta_dataset_forward_batch(xs, ys, ws, bs)
    out_b = jax.block_until_ready(out_b)
    assert out_b.shape == (B, N)
    for i in range(B):
        ref_i = _reference(xs[i], ys[i], ws[i], bs[i])
        assert jnp.allclose(out_b[i], ref_i, atol=1e-5, rtol=1e-5), \
            f"batched mismatch at task {i}"

    print("KERNEL_OK")
</pallas_src>

<mosaic_0001>
module attributes {stable_mosaic.version = 11 : i64} {
  func.func @_meta_kernel(%arg0: memref<1x8x128xf32, #tpu.memory_space<vmem>>, %arg1: memref<1x8x1xf32, #tpu.memory_space<vmem>>, %arg2: memref<1x1x128xf32, #tpu.memory_space<vmem>>) attributes {dimension_semantics = [], scalar_prefetch = 0 : i64, scratch_operands = 0 : i64, tpu.core_type = #tpu.core_type<tc>} {
    %c0 = arith.constant 0 : index
    %c0_0 = arith.constant 0 : index
    %c0_1 = arith.constant 0 : index
    %0 = vector.load %arg0[%c0, %c0_0, %c0_1] : memref<1x8x128xf32, #tpu.memory_space<vmem>>, vector<1x8x128xf32>
    %c0_2 = arith.constant 0 : index
    %c0_3 = arith.constant 0 : index
    %c0_4 = arith.constant 0 : index
    %1 = vector.load %arg1[%c0_2, %c0_3, %c0_4] : memref<1x8x1xf32, #tpu.memory_space<vmem>>, vector<1x8x1xf32>
    %2 = vector.extract_strided_slice %0 {offsets = [0, 3, 0], sizes = [1, 1, 128], strides = [1, 1, 1]} : vector<1x8x128xf32> to vector<1x1x128xf32>
    %3 = tpu.iota {dimensions = array<i32: 1>} : vector<1x8x1xi32>
    %c2_i32 = arith.constant 2 : i32
    %4 = vector.broadcast %c2_i32 : i32 to vector<1x8x1xi32>
    %5 = arith.cmpi sle, %3, %4 : vector<1x8x1xi32>
    %cst = arith.constant 9.99999974E-5 : f32
    %cst_5 = arith.constant 0.000000e+00 : f32
    %6 = vector.broadcast %cst : f32 to vector<1x8x1xf32>
    %7 = vector.broadcast %cst_5 : f32 to vector<1x8x1xf32>
    %8 = arith.select %5, %6, %7 : vector<1x8x1xi1>, vector<1x8x1xf32>
    %9 = vector.broadcast %1 : vector<1x8x1xf32> to vector<1x8x128xf32>
    %10 = arith.mulf %9, %0 : vector<1x8x128xf32>
    %cst_6 = arith.constant dense<0.000000e+00> : vector<1x128xf32>
    %11 = vector.multi_reduction <add>, %10, %cst_6 [1] : vector<1x8x128xf32> to vector<1x128xf32>
    %12 = vector.shape_cast %11 : vector<1x128xf32> to vector<1x1x128xf32>
    %13 = arith.negf %12 : vector<1x1x128xf32>
    %14 = math.exp %13 : vector<1x1x128xf32>
    %cst_7 = arith.constant 1.000000e+00 : f32
    %15 = vector.broadcast %cst_7 : f32 to vector<1x1x128xf32>
    %16 = arith.addf %15, %14 : vector<1x1x128xf32>
    %17 = arith.divf %15, %16 : vector<1x1x128xf32>
    %18 = arith.subf %17, %2 : vector<1x1x128xf32>
    %19 = vector.broadcast %18 : vector<1x1x128xf32> to vector<1x8x128xf32>
    %20 = arith.mulf %0, %19 : vector<1x8x128xf32>
    %cst_8 = arith.constant dense<0.000000e+00> : vector<1x8xf32>
    %21 = vector.multi_reduction <add>, %20, %cst_8 [2] : vector<1x8x128xf32> to vector<1x8xf32>
    %22 = vector.shape_cast %21 : vector<1x8xf32> to vector<1x8x1xf32>
    %23 = arith.mulf %8, %22 : vector<1x8x1xf32>
    %24 = arith.subf %1, %23 : vector<1x8x1xf32>
    %25 = vector.broadcast %24 : vector<1x8x1xf32> to vector<1x8x128xf32>
    %26 = arith.mulf %25, %0 : vector<1x8x128xf32>
    %cst_9 = arith.constant dense<0.000000e+00> : vector<1x128xf32>
    %27 = vector.multi_reduction <add>, %26, %cst_9 [1] : vector<1x8x128xf32> to vector<1x128xf32>
    %28 = vector.shape_cast %27 : vector<1x128xf32> to vector<1x1x128xf32>
    %29 = arith.negf %28 : vector<1x1x128xf32>
    %30 = math.exp %29 : vector<1x1x128xf32>
    %cst_10 = arith.constant 1.000000e+00 : f32
    %31 = vector.broadcast %cst_10 : f32 to vector<1x1x128xf32>
    %32 = arith.addf %31, %30 : vector<1x1x128xf32>
    %33 = arith.divf %31, %32 : vector<1x1x128xf32>
    %34 = arith.subf %33, %2 : vector<1x1x128xf32>
    %35 = vector.broadcast %34 : vector<1x1x128xf32> to vector<1x8x128xf32>
    %36 = arith.mulf %0, %35 : vector<1x8x128xf32>
    %cst_11 = arith.constant dense<0.000000e+00> : vector<1x8xf32>
    %37 = vector.multi_reduction <add>, %36, %cst_11 [2] : vector<1x8x128xf32> to vector<1x8xf32>
    %38 = vector.shape_cast %37 : vector<1x8xf32> to vector<1x8x1xf32>
    %39 = arith.mulf %8, %38 : vector<1x8x1xf32>
    %40 = arith.subf %24, %39 : vector<1x8x1xf32>
    %41 = vector.broadcast %40 : vector<1x8x1xf32> to vector<1x8x128xf32>
    %42 = arith.mulf %41, %0 : vector<1x8x128xf32>
    %cst_12 = arith.constant dense<0.000000e+00> : vector<1x128xf32>
    %43 = vector.multi_reduction <add>, %42, %cst_12 [1] : vector<1x8x128xf32> to vector<1x128xf32>
    %44 = vector.shape_cast %43 : vector<1x128xf32> to vector<1x1x128xf32>
    %45 = arith.negf %44 : vector<1x1x128xf32>
    %46 = math.exp %45 : vector<1x1x128xf32>
    %cst_13 = arith.constant 1.000000e+00 : f32
    %47 = vector.broadcast %cst_13 : f32 to vector<1x1x128xf32>
    %48 = arith.addf %47, %46 : vector<1x1x128xf32>
    %49 = arith.divf %47, %48 : vector<1x1x128xf32>
    %50 = arith.subf %49, %2 : vector<1x1x128xf32>
    %51 = vector.broadcast %50 : vector<1x1x128xf32> to vector<1x8x128xf32>
    %52 = arith.mulf %0, %51 : vector<1x8x128xf32>
    %cst_14 = arith.constant dense<0.000000e+00> : vector<1x8xf32>
    %53 = vector.multi_reduction <add>, %52, %cst_14 [2] : vector<1x8x128xf32> to vector<1x8xf32>
    %54 = vector.shape_cast %53 : vector<1x8xf32> to vector<1x8x1xf32>
    %55 = arith.mulf %8, %54 : vector<1x8x1xf32>
    %56 = arith.subf %40, %55 : vector<1x8x1xf32>
    %57 = vector.broadcast %56 : vector<1x8x1xf32> to vector<1x8x128xf32>
    %58 = arith.mulf %57, %0 : vector<1x8x128xf32>
    %cst_15 = arith.constant dense<0.000000e+00> : vector<1x128xf32>
    %59 = vector.multi_reduction <add>, %58, %cst_15 [1] : vector<1x8x128xf32> to vector<1x128xf32>
    %60 = vector.shape_cast %59 : vector<1x128xf32> to vector<1x1x128xf32>
    %c0_16 = arith.constant 0 : index
    %c0_17 = arith.constant 0 : index
    %c0_18 = arith.constant 0 : index
    %61 = vector.load %arg2[%c0_16, %c0_17, %c0_18] : memref<1x1x128xf32, #tpu.memory_space<vmem>>, vector<1x1x128xf32>
    tpu.vector_store %arg2[%c0_16, %c0_17, %c0_18], %60 {strides = array<i32>} : memref<1x1x128xf32, #tpu.memory_space<vmem>>, vector<1x1x128xf32>,
    return
  }
}

</mosaic_0001>

<bundles_post_ra>
// kernel: meta_dataset_forward_batch.1
= control target key start
LH: loop header
LB: loop body
LE: loop exit
PB: predicated region body
PF: predicated region fallthrough
CT: control target
= control target key end

     0   :  { %v137_v0 = vmov 0   ;;  %v13_v14 = vlaneseq  ;;  %v138_v21 = vmov 0.0   ;;  %s175_s1 = inlined_call_operand.vmem [shape: f32[1,8,1], index: 1, kind: input, shape index: {}]   ;;  %s176_s0 = inlined_call_operand.vmem [shape: f32[1,8,128], index: 0, kind: input, shape index: {}]   ;;  %s177_s2 = inlined_call_operand.vmem [shape: f32[1,1,128], index: 2, kind: output, shape index: {}]  }
   0x1   :  { %123 = vset.pattern.permute.xlu0 %v137_v0  ;;  %v12_v1 = vld [vmem:[%s175_s1] sm:$0xff]  ;;  %124 = vset.pattern.permute.xlu1 %v137_v0 }
   0x2   :  { %19 = vperm.xlu0 %123, %v12_v1   ;;  %v160_v2 = vld [vmem:[%s176_s0] sm:$0xff]  ;;  %v14_v15 = vshrl.u32 %v13_v14, 7 }
   0x4   :  { %v38_v16 = vsub.s32 3, %v14_v15  ;;  %vm15_vm0 = vcmp.le.s32.totalorder %v14_v15, 2 }
   0x5   :  { %v16_v22 = vsel %vm15_vm0, 0.0001, %v138_v21 }
  0x81   :  { %v20_v3 = vpop.permute.xlu0 %19 }
  0x82   :  { %v22_v4 = vmul.f32 %v20_v3, %v160_v2 }
  0x84   :  { %v23_v5 = vrot.slane %v22_v4, 4 }
  0x86   :  { %v24_v6 = vadd.f32 %v23_v5, %v22_v4 }
  0x88   :  { %v25_v7 = vrot.slane %v24_v6, 2 }
  0x8a   :  { %v26_v8 = vadd.f32 %v25_v7, %v24_v6 }
  0x8c   :  { %v27_v9 = vrot.slane %v26_v8, 1 }
  0x8e   :  { %v28_v10 = vadd.f32 %v27_v9, %v26_v8 }
  0x90   :  { %v118_v11 = vmul.f32 -1.442695, %v28_v10 }
  0x92   :  { %125 = vpow2.f32 %v118_v11 }
  0x9c   :  { %v126_v12 = vpop.eup %125 }
  0x9d   :  { %v32_v13 = vadd.f32 1.0, %v126_v12 }
  0x9f   :  { %127 = vrcp.f32 %v32_v13 }
  0xa9   :  { %v128_v17 = vpop.eup %127 }
  0xaa   :  { %v35_v18 = vsub.f32 %v128_v17, %v160_v2 }
  0xac   :  { %v39_v19 = vrot.slane %v35_v18, %v38_v16 }
  0xae   :  { %v40_v20 = vmul.f32 %v39_v19, %v160_v2 }
  0xb0   :  { %41 = vadd.xlane.f32.xlu0 %v40_v20 }
 0x13d   :  { %v42_v23 = vpop.xlane.xlu0 %41 }
 0x13e   :  { %v43_v24 = vmul.f32 %v42_v23, %v16_v22 }
 0x140   :  { %v44_v25 = vsub.f32 %v12_v1, %v43_v24 }
 0x142   :  { %47 = vperm.xlu1 %124, %v44_v25  }
 0x1c1   :  { %v48_v26 = vpop.permute.xlu1 %47 }
 0x1c2   :  { %v50_v27 = vmul.f32 %v48_v26, %v160_v2 }
 0x1c4   :  { %v51_v28 = vrot.slane %v50_v27, 4 }
 0x1c6   :  { %v52_v29 = vadd.f32 %v51_v28, %v50_v27 }
 0x1c8   :  { %v53_v30 = vrot.slane %v52_v29, 2 }
 0x1ca   :  { %v54_v31 = vadd.f32 %v53_v30, %v52_v29 }
 0x1cc   :  { %v55_v32 = vrot.slane %v54_v31, 1 }
 0x1ce   :  { %v56_v33 = vadd.f32 %v55_v32, %v54_v31 }
 0x1d0   :  { %v119_v34 = vmul.f32 -1.442695, %v56_v33 }
 0x1d2   :  { %129 = vpow2.f32 %v119_v34 }
 0x1dc   :  { %v130_v35 = vpop.eup %129 }
 0x1dd   :  { %v60_v36 = vadd.f32 1.0, %v130_v35 }
 0x1df   :  { %131 = vrcp.f32 %v60_v36 }
 0x1e9   :  { %v132_v37 = vpop.eup %131 }
 0x1ea   :  { %v63_v38 = vsub.f32 %v132_v37, %v160_v2 }
 0x1ec   :  { %v67_v39 = vrot.slane %v63_v38, %v38_v16 }
 0x1ee   :  { %v68_v40 = vmul.f32 %v67_v39, %v160_v2 }
 0x1f0   :  { %69 = vadd.xlane.f32.xlu1 %v68_v40 }
 0x27d   :  { %v70_v41 = vpop.xlane.xlu1 %69 }
 0x27e   :  { %v71_v42 = vmul.f32 %v70_v41, %v16_v22 }
 0x280   :  { %v72_v43 = vsub.f32 %v44_v25, %v71_v42 }
 0x282   :  { %75 = vperm.xlu0 %123, %v72_v43  }
 0x301   :  { %v76_v44 = vpop.permute.xlu0 %75 }
 0x302   :  { %v78_v45 = vmul.f32 %v76_v44, %v160_v2 }
 0x304   :  { %v79_v46 = vrot.slane %v78_v45, 4 }
 0x306   :  { %v80_v47 = vadd.f32 %v79_v46, %v78_v45 }
 0x308   :  { %v81_v48 = vrot.slane %v80_v47, 2 }
 0x30a   :  { %v82_v49 = vadd.f32 %v81_v48, %v80_v47 }
 0x30c   :  { %v83_v50 = vrot.slane %v82_v49, 1 }
 0x30e   :  { %v84_v51 = vadd.f32 %v83_v50, %v82_v49 }
 0x310   :  { %v120_v52 = vmul.f32 -1.442695, %v84_v51 }
 0x312   :  { %133 = vpow2.f32 %v120_v52 }
 0x31c   :  { %v134_v53 = vpop.eup %133 }
 0x31d   :  { %v88_v54 = vadd.f32 1.0, %v134_v53 }
 0x31f   :  { %135 = vrcp.f32 %v88_v54 }
 0x329   :  { %v136_v55 = vpop.eup %135 }
 0x32a   :  { %v91_v56 = vsub.f32 %v136_v55, %v160_v2 }
 0x32c   :  { %v95_v57 = vrot.slane %v91_v56, %v38_v16 }
 0x32e   :  { %v96_v58 = vmul.f32 %v95_v57, %v160_v2 }
 0x330   :  { %97 = vadd.xlane.f32.xlu1 %v96_v58 }
 0x3bd   :  { %v98_v59 = vpop.xlane.xlu1 %97 }
 0x3be   :  { %v99_v60 = vmul.f32 %v98_v59, %v16_v22 }
 0x3c0   :  { %v100_v61 = vsub.f32 %v72_v43, %v99_v60 }
 0x3c2   :  { %103 = vperm.xlu1 %124, %v100_v61  }
 0x441   :  { %v104_v62 = vpop.permute.xlu1 %103 }
 0x442   :  { %v106_v63 = vmul.f32 %v104_v62, %v160_v2 }
 0x444   :  { %v107_v0 = vrot.slane %v106_v63, 4 }
 0x446   :  { %v108_v1 = vadd.f32 %v107_v0, %v106_v63 }
 0x448   :  { %v109_v3 = vrot.slane %v108_v1, 2 }
 0x44a   :  { %v110_v4 = vadd.f32 %v109_v3, %v108_v1 }
 0x44c   :  { %v111_v5 = vrot.slane %v110_v4, 1 }
 0x44e   :  { %v112_v6 = vadd.f32 %v111_v5, %v110_v4 }
 0x450   :  { %113 = vst [vmem:[%s177_s2] sm:$0x1] %v112_v6 }

</bundles_post_ra>
